<compile_context>
chip_gen: v5e
topology: v5e:2x2
jax: 0.10.0
libtpu: 0.0.40
codegen_flags: <defaults>
</compile_context>

<pallas_src>
import functools

import jax
import jax.numpy as jnp
import numpy as np
from jax.experimental import pallas as pl
from jax.experimental.pallas import tpu as pltpu


def _default_tile_n():
    """256 lanes per vertex tile on v6e/v7x (2x256^2 MXU), 128 elsewhere."""
    try:
        kind = jax.devices()[0].device_kind.lower()
    except Exception:
        kind = ""
    return 256 if ("v6" in kind or "v7" in kind) else 128


# ----------------------------------------------------------------------------
# Kernel 1: bilinear uv sampling of the displacement texture + vertex_initial
#
#   out[c, n] = sum_{h,w} tex[c, h, w] * w_row[h, n] * w_col[w, n] + vinit[c, n]
#
# Separable bilinear weights (align_corners=True, uv in [0, 1]):
#   w_col[w, n] = relu(1 - |w - px[n]|),  px = u * (W - 1)
#   w_row[h, n] = relu(1 - |h - py[n]|),  py = v * (H - 1)
# The W-contraction runs on the MXU in bf16 ([(C*H), W] @ [W, tile_n], f32 acc);
# the H-contraction is an f32 multiply + sublane reduce.  All stored tensors are
# lane-dense ([*, tile_n] or [*, W]).
# ----------------------------------------------------------------------------
def _uv_sampling_kernel(tex_ref, xs_ref, ys_ref, uv_ref, vinit_ref, out_ref, *, H, W, C):
    tile_n = uv_ref.shape[1]

    px = uv_ref[0:1, :] * (W - 1.0)                         # [1, tile_n]
    py = uv_ref[1:2, :] * (H - 1.0)                         # [1, tile_n]

    # Bilinear weights (f32 VPU math); xs/ys are step-invariant constant inputs.
    w_col = jnp.maximum(1.0 - jnp.abs(xs_ref[...] - px), 0.0)   # [W, tile_n]
    w_row = jnp.maximum(1.0 - jnp.abs(ys_ref[...] - py), 0.0)   # [H, tile_n]

    # MXU: contract over W.  tex_ref is bf16 [(C*H), W]; single bf16 pass, f32 acc.
    tmp = jnp.dot(tex_ref[...], w_col.astype(tex_ref.dtype),
                  preferred_element_type=jnp.float32)           # [(C*H), tile_n]

    # VPU/XLU: contract over H.
    if H % 8 == 0:
        # Free leading-dim split (H is sublane-aligned), one fused reduce.
        sampled = jnp.sum(tmp.reshape(C, H, tile_n) * w_row[None, :, :], axis=1)
    else:
        chans = [jnp.sum(tmp[c * H:(c + 1) * H, :] * w_row, axis=0, keepdims=True)
                 for c in range(C)]
        sampled = jnp.concatenate(chans, axis=0)                # [C, tile_n]

    out_ref[...] = (sampled + vinit_ref[...]).astype(out_ref.dtype)


def uv_sampling_add(disp_cf, uv, vinit, *, tile_n=None):
    """disp_cf: [C, H, W] (channels-first); uv: [N, 2] in [0, 1]; vinit: [N, C] -> [N, C]."""
    C, H, W = disp_cf.shape
    N = uv.shape[0]
    if tile_n is None:
        tile_n = _default_tile_n()

    # Contract the larger spatial dim on the MXU; the tmp intermediate and the
    # VPU H-contraction then scale with the smaller one.
    if H > W:
        disp_cf = jnp.swapaxes(disp_cf, 1, 2)   # (C, W, H)
        uv = uv[:, ::-1]                        # swap (u, v)
        H, W = W, H

    n_pad = pl.cdiv(N, tile_n) * tile_n

    # Channels-first storage makes this a free reshape (no HBM transpose per call);
    # bf16 halves the resident texture footprint and its DMA bytes.
    tex_2d = disp_cf.reshape(C * H, W).astype(jnp.bfloat16)
    uv_t = jnp.pad(jnp.transpose(uv.astype(jnp.float32)), ((0, 0), (0, n_pad - N)))
    vinit_t = jnp.pad(jnp.transpose(vinit.astype(jnp.float32)),
                      ((0, 0), (0, n_pad - N)))
    # Step-invariant iota grids, built once and single-buffered in VMEM.
    xs = jnp.broadcast_to(jnp.arange(W, dtype=jnp.float32)[:, None], (W, tile_n))
    ys = jnp.broadcast_to(jnp.arange(H, dtype=jnp.float32)[:, None], (H, tile_n))

    # VMEM budget: single-buffered bf16 texture + iotas + double-buffered per-tile
    # blocks + a few (C*H, tile_n) f32 intermediates.  Cap at 64 MiB (v7x physical).
    # TODO(synk): maps too large for a resident texture need a reduction grid axis
    # over texture row-blocks (P3 accumulator pattern).
    needed = (C * H * W * 2 + 3 * (H + W) * tile_n * 4
              + 6 * C * H * tile_n * 4 + (4 << 20))
    vmem_limit = int(min(max(needed, 32 << 20), 64 << 20))

    kernel = functools.partial(_uv_sampling_kernel, H=H, W=W, C=C)
    out_t = pl.pallas_call(
        kernel,
        out_shape=jax.ShapeDtypeStruct((C, n_pad), jnp.float32),
        grid=(n_pad // tile_n,),
        in_specs=[
            # Full texture / iotas every step; constant index_map -> single-buffered.
            pl.BlockSpec((C * H, W), lambda i: (0, 0), pipeline_mode=pl.Buffered(1)),
            pl.BlockSpec((W, tile_n), lambda i: (0, 0), pipeline_mode=pl.Buffered(1)),
            pl.BlockSpec((H, tile_n), lambda i: (0, 0), pipeline_mode=pl.Buffered(1)),
            pl.BlockSpec((2, tile_n), lambda i: (0, i)),
            pl.BlockSpec((C, tile_n), lambda i: (0, i)),
        ],
        out_specs=pl.BlockSpec((C, tile_n), lambda i: (0, i)),
        compiler_params=pltpu.CompilerParams(
            dimension_semantics=("parallel",),
            vmem_limit_bytes=vmem_limit),
    )(tex_2d, xs, ys, uv_t, vinit_t)
    return jnp.transpose(out_t)[:N, :]


# ----------------------------------------------------------------------------
# Kernel 2: total-variation loss (DiffOptimizer.tv_loss) on the channels-first
# displacement map, viewed as the free lane-dense [C*H, W] slab.
#
# A "parallel" grid of row-blocks emits one partial sum per block (usable by both
# TensorCores on v7x); the wrapper fixes up, with tiny jnp ops:
#   (a) H-diff pairs that straddle block boundaries,
#   (b) tail rows not covered by full blocks,
#   (c) the C-1 channel-boundary row pairs the blocks over-count.
# ----------------------------------------------------------------------------
def _tv_block_kernel(img_ref, out_ref, *, inv_nx, inv_ny):
    blk = img_ref[...]                                     # [tb, W]
    sx = jnp.sum(jnp.abs(blk[1:, :] - blk[:-1, :]))        # in-block H diffs
    sy = jnp.sum(jnp.abs(blk[:, 1:] - blk[:, :-1]))        # W diffs
    out_ref[...] = jnp.full((1, 8, 128), sx * inv_nx + sy * inv_ny, jnp.float32)


def tv_loss(disp_cf, *, tile_h=256):
    """TV loss of a channels-first [C, H, W] map: mean|dH| + mean|dW| (== torch tv_loss)."""
    C, H, W = disp_cf.shape
    img2 = disp_cf.astype(jnp.float32).reshape(C * H, W)   # free lane-dense view
    R = C * H
    inv_nx = 1.0 / (C * (H - 1) * W)
    inv_ny = 1.0 / (C * H * (W - 1))

    tb = max(8, (min(tile_h, R) // 8) * 8) if R >= 8 else R
    nb = R // tb
    tail_start = nb * tb

    kernel = functools.partial(_tv_block_kernel, inv_nx=inv_nx, inv_ny=inv_ny)
    vmem_limit = int(min(max(4 * tb * W * 4 + (8 << 20), 32 << 20), 64 << 20))
    parts = pl.pallas_call(
        kernel,
        out_shape=jax.ShapeDtypeStruct((nb, 8, 128), jnp.float32),
        grid=(nb,),
        in_specs=[pl.BlockSpec((tb, W), lambda i: (i, 0))],
        out_specs=pl.BlockSpec((1, 8, 128), lambda i: (i, 0, 0)),
        compiler_params=pltpu.CompilerParams(
            dimension_semantics=("parallel",),
            vmem_limit_bytes=vmem_limit),
    )(img2)
    loss = jnp.sum(parts[:, 0, 0])

    # (a) H-diff pairs straddling block boundaries (skip channel boundaries).
    if nb > 1:
        rs = np.arange(1, nb) * tb
        keep = jnp.asarray(((rs % H) != 0).astype(np.float32))
        tops = img2[tb:tail_start:tb]
        bots = img2[tb - 1:tail_start - 1:tb]
        loss = loss + jnp.sum(jnp.abs(tops - bots) * keep[:, None]) * inv_nx

    # (b) tail rows not covered by full blocks.
    if tail_start < R:
        rs = np.arange(tail_start, R)
        keep = jnp.asarray(((rs % H) != 0).astype(np.float32))
        seg = img2[tail_start - 1:]
        loss = loss + jnp.sum(jnp.abs(seg[1:] - seg[:-1]) * keep[:, None]) * inv_nx
        tail_rows = img2[tail_start:]
        loss = loss + jnp.sum(jnp.abs(tail_rows[:, 1:] - tail_rows[:, :-1])) * inv_ny

    # (c) subtract channel-boundary row pairs the blocks over-counted.
    over = [c * H for c in range(1, C) if (c * H) < tail_start and (c * H) % tb != 0]
    if over:
        idx = np.asarray(over)
        loss = loss - jnp.sum(jnp.abs(img2[idx] - img2[idx - 1])) * inv_nx
    return loss


# ----------------------------------------------------------------------------
# Kernel 3: MSE loss (nn.MSELoss, mean reduction).  Used by the image-space l2
# losses of forward() once a rasterizer is available.  "parallel" row-block grid
# with per-block partial sums; no jnp.pad (tail rows handled in the wrapper).
# ----------------------------------------------------------------------------
def _mse_block_kernel(a_ref, b_ref, out_ref, *, inv_count):
    d = a_ref[...] - b_ref[...]
    out_ref[...] = jnp.full((1, 8, 128), jnp.sum(d * d) * inv_count, jnp.float32)


def mse_loss(a, b, *, tile_rows=512):
    assert a.shape == b.shape
    count = int(np.prod(a.shape))

    def view2d(x):
        x = x.astype(jnp.float32)
        return x.reshape(x.shape[0], -1) if x.ndim >= 2 else x.reshape(1, -1)

    a2, b2 = view2d(a), view2d(b)
    R, K = a2.shape
    inv_count = 1.0 / count

    tb = max(8, (min(tile_rows, R) // 8) * 8) if R >= 8 else R
    nb = R // tb
    tail_start = nb * tb

    kernel = functools.partial(_mse_block_kernel, inv_count=inv_count)
    vmem_limit = int(min(max(4 * tb * K * 4 + (8 << 20), 32 << 20), 64 << 20))
    parts = pl.pallas_call(
        kernel,
        out_shape=jax.ShapeDtypeStruct((nb, 8, 128), jnp.float32),
        grid=(nb,),
        in_specs=[pl.BlockSpec((tb, K), lambda i: (i, 0))] * 2,
        out_specs=pl.BlockSpec((1, 8, 128), lambda i: (i, 0, 0)),
        compiler_params=pltpu.CompilerParams(
            dimension_semantics=("parallel",),
            vmem_limit_bytes=vmem_limit),
    )(a2, b2)
    loss = jnp.sum(parts[:, 0, 0])
    if tail_start < R:
        d = a2[tail_start:] - b2[tail_start:]
        loss = loss + jnp.sum(d * d) * inv_count
    return loss


# ----------------------------------------------------------------------------
# Forward: one optimization-step's differentiable compute (sans renderer).
# disp is kept channels-first [C, H, W] as the canonical optimizer-state layout.
# ----------------------------------------------------------------------------
def diff_optimizer_forward(disp_cf, uv_vts, vertex_initial, seam, weights):
    # mesh_smpl.vertices = uv_sampling(disp_opt, uv_vts) + vertex_initial
    vertices = uv_sampling_add(disp_cf, uv_vts, vertex_initial)

    # seam loss: l2(vertices[seam[:,0]], vertices[seam[:,1]]) * weights['seam'].
    # ~|seam|x3 elements -> plain jnp (a pallas_call here is pure launch overhead).
    d = jnp.take(vertices, seam[:, 0], axis=0) - jnp.take(vertices, seam[:, 1], axis=0)
    loss = weights["seam"] * jnp.mean(d * d)

    # smoothness loss: tv_loss(disp_opt) * weights['smooth']
    loss = loss + weights["smooth"] * tv_loss(disp_cf)

    # TODO(synk): color/depth/normal/disp losses need nvdiffrast rasterize / interpolate /
    # texture / antialias, and laplacian_loss plus the Adam + LambdaLR loop are host-side
    # optimization logic — no Pallas equivalent.  mse_loss() above is the kernel those
    # image-space l2 terms would use.
    return vertices, loss


# ----------------------------------------------------------------------------
# Pure-JAX reference for the uv_sampling hot path (correctness check only).
# tex here is (H, W, C); uv in [0, 1].
# ----------------------------------------------------------------------------
def _uv_sampling_ref(tex, uv, vinit):
    H, W, _ = tex.shape
    px = uv[:, 0] * (W - 1.0)
    py = uv[:, 1] * (H - 1.0)
    x0f = jnp.floor(px); y0f = jnp.floor(py)
    wx = (px - x0f)[:, None]; wy = (py - y0f)[:, None]
    x0 = jnp.clip(x0f.astype(jnp.int32), 0, W - 1); x1 = jnp.clip(x0 + 1, 0, W - 1)
    y0 = jnp.clip(y0f.astype(jnp.int32), 0, H - 1); y1 = jnp.clip(y0 + 1, 0, H - 1)
    g = lambda yy, xx: tex[yy, xx, :]
    out = (g(y0, x0) * (1 - wx) * (1 - wy) + g(y0, x1) * wx * (1 - wy) +
           g(y1, x0) * (1 - wx) * wy + g(y1, x1) * wx * wy)
    return out + vinit


if __name__ == "__main__":
    key = jax.random.PRNGKey(0)
    k1, k2, k3, k4, k5, k6, k7 = jax.random.split(key, 7)

    C, H, W = 3, 16, 16       # small displacement texture (channels-first)
    N = 200                   # number of mesh / UV vertices (exercises tile padding)
    S = 16                    # number of seam pairs

    disp_cf = 0.1 * jax.random.normal(k1, (C, H, W), dtype=jnp.float32)
    uv_vts = jax.random.uniform(k2, (N, 2), dtype=jnp.float32)        # in [0, 1]
    vertex_initial = jax.random.normal(k3, (N, C), dtype=jnp.float32)
    # deterministic synthetic seam index pairs (stand-in for the SMPL uv_mapper json)
    seam = jnp.stack([jnp.arange(0, S, dtype=jnp.int32),
                      jnp.arange(S, 2 * S, dtype=jnp.int32)], axis=1)
    weights = {"color": 1.0, "depth": 1.0, "disp": 0.1, "normal": 1.0,
               "seam": 100.0, "smooth": 1.0, "laplacian": 10.0}

    vertices, loss = diff_optimizer_forward(disp_cf, uv_vts, vertex_initial, seam, weights)
    jax.block_until_ready((vertices, loss))

    # --- check uv_sampling + vertex_initial (bf16 MXU path -> ~1e-3 accuracy) ---
    disp_hwc = jnp.transpose(disp_cf, (1, 2, 0))
    ref_verts = _uv_sampling_ref(disp_hwc, uv_vts, vertex_initial)
    np.testing.assert_allclose(np.asarray(vertices), np.asarray(ref_verts),
                               atol=3e-3, rtol=3e-3)

    # --- check tv_loss ---
    ref_tv = (jnp.mean(jnp.abs(disp_hwc[1:] - disp_hwc[:-1])) +
              jnp.mean(jnp.abs(disp_hwc[:, 1:] - disp_hwc[:, :-1])))
    np.testing.assert_allclose(float(tv_loss(disp_cf)), float(ref_tv),
                               rtol=1e-4, atol=1e-6)

    # --- check full loss ---
    ref_seam = weights["seam"] * jnp.mean(
        (ref_verts[seam[:, 0]] - ref_verts[seam[:, 1]]) ** 2)
    ref_loss = ref_seam + weights["smooth"] * ref_tv
    np.testing.assert_allclose(float(loss), float(ref_loss), rtol=1e-2, atol=1e-2)

    # --- rectangular map exercises the "contract the larger dim on the MXU" swap ---
    disp2 = 0.1 * jax.random.normal(k4, (C, 24, 16), dtype=jnp.float32)   # H > W
    uv2 = jax.random.uniform(k5, (N, 2), dtype=jnp.float32)
    v2 = uv_sampling_add(disp2, uv2, vertex_initial)
    ref2 = _uv_sampling_ref(jnp.transpose(disp2, (1, 2, 0)), uv2, vertex_initial)
    np.testing.assert_allclose(np.asarray(v2), np.asarray(ref2), atol=3e-3, rtol=3e-3)

    # --- check the MSE kernel (stand-in for the renderer-based l2 image losses) ---
    img_a = jax.random.normal(k6, (64, 96, 3), dtype=jnp.float32)
    img_b = img_a + 0.05 * jax.random.normal(k7, (64, 96, 3), dtype=jnp.float32)
    mse = mse_loss(img_a, img_b)
    jax.block_until_ready(mse)
    np.testing.assert_allclose(float(mse), float(jnp.mean((img_a - img_b) ** 2)),
                               rtol=1e-4, atol=1e-8)

    print("KERNEL_OK")
</pallas_src>

<mosaic_0001>
module attributes {stable_mosaic.version = 11 : i64} {
  func.func @_uv_sampling_kernel(%arg0: i32, %arg1: memref<48x16xbf16, #tpu.memory_space<vmem>>, %arg2: memref<16x128xf32, #tpu.memory_space<vmem>>, %arg3: memref<16x128xf32, #tpu.memory_space<vmem>>, %arg4: memref<2x128xf32, #tpu.memory_space<vmem>>, %arg5: memref<3x128xf32, #tpu.memory_space<vmem>>, %arg6: memref<3x128xf32, #tpu.memory_space<vmem>>) attributes {dimension_semantics = [#tpu.dimension_semantics<parallel>], iteration_bounds = array<i64: 2>, scalar_prefetch = 0 : i64, scratch_operands = 0 : i64, tpu.core_type = #tpu.core_type<tc>, window_params = [{pipeline_mode = #tpu.pipeline_mode<synchronous>, transform_indices = @transform_0, window_bounds = array<i64: 48, 16>}, {pipeline_mode = #tpu.pipeline_mode<synchronous>, transform_indices = @transform_1, window_bounds = array<i64: 16, 128>}, {pipeline_mode = #tpu.pipeline_mode<synchronous>, transform_indices = @transform_2, window_bounds = array<i64: 16, 128>}, {transform_indices = @transform_3, window_bounds = array<i64: 2, 128>}, {transform_indices = @transform_4, window_bounds = array<i64: 3, 128>}, {transform_indices = @transform_5, window_bounds = array<i64: 3, 128>}]} {
    %c0 = arith.constant 0 : index
    %c0_0 = arith.constant 0 : index
    %0 = vector.load %arg4[%c0, %c0_0] : memref<2x128xf32, #tpu.memory_space<vmem>>, vector<1x128xf32>
    %cst = arith.constant 1.500000e+01 : f32
    %1 = vector.broadcast %cst : f32 to vector<1x128xf32>
    %2 = arith.mulf %0, %1 : vector<1x128xf32>
    %c1 = arith.constant 1 : index
    %c0_1 = arith.constant 0 : index
    %3 = vector.load %arg4[%c1, %c0_1] : memref<2x128xf32, #tpu.memory_space<vmem>>, vector<1x128xf32>
    %cst_2 = arith.constant 1.500000e+01 : f32
    %4 = vector.broadcast %cst_2 : f32 to vector<1x128xf32>
    %5 = arith.mulf %3, %4 : vector<1x128xf32>
    %c0_3 = arith.constant 0 : index
    %c0_4 = arith.constant 0 : index
    %6 = vector.load %arg2[%c0_3, %c0_4] : memref<16x128xf32, #tpu.memory_space<vmem>>, vector<16x128xf32>
    %7 = vector.broadcast %2 : vector<1x128xf32> to vector<16x128xf32>
    %8 = arith.subf %6, %7 : vector<16x128xf32>
    %9 = math.absf %8 : vector<16x128xf32>
    %cst_5 = arith.constant 1.000000e+00 : f32
    %10 = vector.broadcast %cst_5 : f32 to vector<16x128xf32>
    %11 = arith.subf %10, %9 : vector<16x128xf32>
    %cst_6 = arith.constant 0.000000e+00 : f32
    %12 = vector.broadcast %cst_6 : f32 to vector<16x128xf32>
    %13 = arith.maximumf %11, %12 : vector<16x128xf32>
    %c0_7 = arith.constant 0 : index
    %c0_8 = arith.constant 0 : index
    %14 = vector.load %arg3[%c0_7, %c0_8] : memref<16x128xf32, #tpu.memory_space<vmem>>, vector<16x128xf32>
    %15 = vector.broadcast %5 : vector<1x128xf32> to vector<16x128xf32>
    %16 = arith.subf %14, %15 : vector<16x128xf32>
    %17 = math.absf %16 : vector<16x128xf32>
    %cst_9 = arith.constant 1.000000e+00 : f32
    %18 = vector.broadcast %cst_9 : f32 to vector<16x128xf32>
    %19 = arith.subf %18, %17 : vector<16x128xf32>
    %cst_10 = arith.constant 0.000000e+00 : f32
    %20 = vector.broadcast %cst_10 : f32 to vector<16x128xf32>
    %21 = arith.maximumf %19, %20 : vector<16x128xf32>
    %c0_11 = arith.constant 0 : index
    %c0_12 = arith.constant 0 : index
    %22 = vector.load %arg1[%c0_11, %c0_12] : memref<48x16xbf16, #tpu.memory_space<vmem>>, vector<48x16xbf16>
    %23 = arith.truncf %13 : vector<16x128xf32> to vector<16x128xbf16>
    %cst_13 = arith.constant dense<0.000000e+00> : vector<48x128xf32>
    %24 = tpu.matmul %22, %23, %cst_13 {dimension_numbers = #tpu.dot_dimension_numbers<[1], [0], [0], [1], [0, 0, 1, 1], [], []>} : vector<48x16xbf16>, vector<16x128xbf16>, vector<48x128xf32> -> vector<48x128xf32>
    %25 = vector.shape_cast %24 : vector<48x128xf32> to vector<3x16x128xf32>
    %26 = vector.shape_cast %21 : vector<16x128xf32> to vector<1x16x128xf32>
    %27 = vector.broadcast %26 : vector<1x16x128xf32> to vector<3x16x128xf32>
    %28 = arith.mulf %25, %27 : vector<3x16x128xf32>
    %cst_14 = arith.constant dense<0.000000e+00> : vector<3x128xf32>
    %29 = vector.multi_reduction <add>, %28, %cst_14 [1] : vector<3x16x128xf32> to vector<3x128xf32>
    %c0_15 = arith.constant 0 : index
    %c0_16 = arith.constant 0 : index
    %30 = vector.load %arg5[%c0_15, %c0_16] : memref<3x128xf32, #tpu.memory_space<vmem>>, vector<3x128xf32>
    %31 = arith.addf %29, %30 : vector<3x128xf32>
    %c0_17 = arith.constant 0 : index
    %c0_18 = arith.constant 0 : index
    %32 = vector.load %arg6[%c0_17, %c0_18] : memref<3x128xf32, #tpu.memory_space<vmem>>, vector<3x128xf32>
    tpu.vector_store %arg6[%c0_17, %c0_18], %31 {strides = array<i32>} : memref<3x128xf32, #tpu.memory_space<vmem>>, vector<3x128xf32>,
    return
  }
  func.func @transform_0(%arg0: i32) -> (i32, i32) {
    %c0_i32 = arith.constant 0 : i32
    %c0_i32_0 = arith.constant 0 : i32
    %c0_i32_1 = arith.constant 0 : i32
    return %c0_i32, %c0_i32_0 : i32, i32
  }
  func.func @transform_1(%arg0: i32) -> (i32, i32) {
    %c0_i32 = arith.constant 0 : i32
    %c0_i32_0 = arith.constant 0 : i32
    %c0_i32_1 = arith.constant 0 : i32
    return %c0_i32, %c0_i32_0 : i32, i32
  }
  func.func @transform_2(%arg0: i32) -> (i32, i32) {
    %c0_i32 = arith.constant 0 : i32
    %c0_i32_0 = arith.constant 0 : i32
    %c0_i32_1 = arith.constant 0 : i32
    return %c0_i32, %c0_i32_0 : i32, i32
  }
  func.func @transform_3(%arg0: i32) -> (i32, i32) {
    %c0_i32 = arith.constant 0 : i32
    %c0_i32_0 = arith.constant 0 : i32
    return %c0_i32, %arg0 : i32, i32
  }
  func.func @transform_4(%arg0: i32) -> (i32, i32) {
    %c0_i32 = arith.constant 0 : i32
    %c0_i32_0 = arith.constant 0 : i32
    return %c0_i32, %arg0 : i32, i32
  }
  func.func @transform_5(%arg0: i32) -> (i32, i32) {
    %c0_i32 = arith.constant 0 : i32
    %c0_i32_0 = arith.constant 0 : i32
    return %c0_i32, %arg0 : i32, i32
  }
}

</mosaic_0001>

<bundles_post_ra>
// kernel: tpu_custom_call.1
= control target key start
LH: loop header
LB: loop body
LE: loop exit
PB: predicated region body
PF: predicated region fallthrough
CT: control target
= control target key end

     0   :  { %s964_s0 = inlined_call_operand.vmem [shape: bf16[48,16], index: 0, kind: input, shape index: {}]   ;;  %s965_s1 = inlined_call_operand.vmem [shape: f32[16,128], index: 1, kind: input, shape index: {}]   ;;  %s966_s2 = inlined_call_operand.vmem [shape: f32[16,128], index: 2, kind: input, shape index: {}]   ;;  %s967_s3 = inlined_call_operand.hbm [shape: f32[2,256], index: 3, kind: input, shape index: {}]   ;;  %s968_s4 = inlined_call_operand.hbm [shape: f32[3,256], index: 4, kind: input, shape index: {}]   ;;  %s969_s5 = inlined_call_operand.hbm [shape: f32[3,256], index: 5, kind: output, shape index: {}]  }
   0x1   :  { %970 = sst [smem:[#allocation12_spill]] %s967_s3 }
   0x2   :  { %10 = vsyncpa [#allocation3], 0 }
   0x3   :  { %12 = vsyncpa [#allocation3 + $0x1], 0 }
   0x4   :  { %13 = vsyncpa [#allocation6], 0 }
   0x5   :  { %15 = vsyncpa [#allocation6 + $0x1], 0 }
   0x6   :  { %16 = vsyncpa [#allocation4], 0 }
   0x7   :  { %18 = vsyncpa [#allocation4 + $0x1], 0  ;;  %s769_s18 = smov 0   ;;  %s771_s19 = smov 0  }
   0x8   :  { %s773_s20 = smov 0   ;;  %s775_s21 = smov 0  }
   0x9 LB: > { %s790_s22 = sadd.s32 4294967295, %s737_s21   ;;  %s521_s23 = sadd.s32 4294967294, %s737_s21   ;;  %s737_s21 = sphi %s775_s21, %s984_s21   ;;  %s733_s20 = sphi %s773_s20, %s983_s20   ;;  %s729_s19 = sphi %s771_s19, %s982_s19   ;;  %s725_s18 = sphi %s769_s18, %s981_s18  }
   0xa   : > { %s794_s24 = sadd.s32 1, %s737_s21   ;;  %s94_s25 = sadd.s32 1, %s733_s20 }
   0xb   : > { %s91_s26 = ssub.s32 %s737_s21, %s794_s24  ;;  %p101_p0 = scmp.ne.s32.totalorder %s733_s20, %s729_s19 }
   0xc   : > { %p92_p1 = scmp.eq.s32.totalorder %s91_s26, 0  ;;  %p102_p2 = scmp.eq.s32.totalorder %s737_s21, 0 }
   0xd   : > { %p107_p3 = scmp.ne.s32.totalorder %s729_s19, %s725_s18  ;;  %p108_p4 = scmp.eq.s32.totalorder %s790_s22, 0 }
   0xe   : > { %s806_s27 = scalar_select %p92_p1, %s733_s20, %s94_s25  }
   0xf   : > { %p808_p5 = por %p102_p2, %p101_p0  ;;  %p812_p6 = por %p108_p4, %p107_p3 }
  0x10   : > { %971 = sst [smem:[#allocation11_spill]] %s806_s27  ;;  %p157_p7 = scmp.eq.s32.totalorder %s790_s22, 1 }
  0x11   : > { %p163_p8 = scmp.eq.s32.totalorder %s521_s23, 1  ;;  %p573_p10 = scmp.lt.s32.totalorder %s737_s21, 2 }
  0x12   : > { %p819_p11 = por %p157_p7, %p101_p0  ;;  %s828_s7 = sand.u32 1, %s733_s20  }
  0x13   : > { %p823_p12 = por %p163_p8, %p107_p3  ;;  %s525_s8 = sshll.u32 %s737_s21, 1 }
  0x14   : > { %s524_s9 = sshll.u32 %s828_s7, 1  ;;  %s976_s3 = sld [smem:[#allocation12_spill]] }
  0x15   : > { %s196_s14 = scalar_lea.vmem [#allocation2], %s524_s9  ;;  %p837_p13 = pnand %p573_p10, %p808_p5 }
  0x16   : > { %s204_s15 = sshll.u32 %s196_s14, 4  ;;  %p528_p0 = scmp.ge.s32.totalorder %s737_s21, 1  ;;  %s205_s15 = int_to_ptr.vmem [resolvable:$true] %s204_s15 }
  0x17   : > { %p228_p1 = scmp.lt.s32.totalorder %s737_s21, 3  ;;  %s526_s17 = sshll.u32 %s828_s7, 2 }
  0x18   : > { %s193_s23 = scalar_lea.sflag [#allocation3], %s828_s7  ;;  %p611_p3 = pneg %p837_p13 }
  0x1a   : > { %s200_s12 = scalar_lea.hbm %s976_s3, %s525_s8  ;;  %s614_s9 = scalar_lea.hbm %s976_s3, 4 }
  0x1b   : > { %s202_s13 = sshll.u32 %s200_s12, 4  ;;  %s203_s13 = int_to_ptr.hbm [resolvable:$true] %s202_s13 }
  0x1c   : > { %s607_s25 = sshra.s32 %s203_s13, 4  ;;  %s608_s25 = int_to_ptr.hbm [resolvable:$true] %s607_s25 }
  0x1d   : > { %s609_s26 = scalar_lea.hbm %s608_s25, 2  ;;  %p615_p5 = scmp.lt.s32.totalorder %s608_s25, %s976_s3 }
  0x1e   : > { %p610_p2 = scmp.ne.s32.totalorder %s608_s25, %s609_s26  ;;  %p616_p8 = scmp.lt.s32.totalorder %s614_s9, %s609_s26 }
  0x20   : > { %p612_p4 = pnand %p611_p3, %p610_p2  ;;  %p617_p10 = por %p616_p8, %p615_p5 }
  0x22   : > { %p613_p7 = pneg %p612_p4 }
  0x24   : > { %p618_p9 = pnand %p617_p10, %p613_p7 }
  0x26   : > { %621 = shalt.err (!%p618_p9)
}
  0x27   : > { %565 = dma.hbm_to_vmem [thread:$0]  (!%p837_p13), %s203_s13, 32, %s205_s15, %s193_s23  }
  0x28   : > { %p862_p2 = pnand %p528_p0, %p228_p1  ;;  %s527_s14 = sshll.u32 %s737_s21, 2 }
  0x29   : > { %s215_s25 = scalar_lea.vmem [#allocation5], %s526_s17  ;;  %s219_s9 = scalar_lea.hbm %s968_s4, %s527_s14 }
  0x2a   : > { %s223_s26 = sshll.u32 %s215_s25, 4  ;;  %s221_s10 = sshll.u32 %s219_s9, 4  ;;  %s224_s26 = int_to_ptr.vmem [resolvable:$true] %s223_s26  ;;  %s222_s10 = int_to_ptr.hbm [resolvable:$true] %s221_s10 }
  0x2b   : > { %s212_s11 = scalar_lea.sflag [#allocation6], %s828_s7  ;;  %s637_s3 = sshra.s32 %s222_s10, 4  ;;  %s638_s3 = int_to_ptr.hbm [resolvable:$true] %s637_s3 }
  0x2c   : > { %s639_s13 = scalar_lea.hbm %s638_s3, 4  ;;  %s644_s17 = scalar_lea.hbm %s968_s4, 8 }
  0x2d   : > { %p640_p9 = scmp.ne.s32.totalorder %s638_s3, %s639_s13  ;;  %p645_p4 = scmp.lt.s32.totalorder %s638_s3, %s968_s4 }
  0x2e   : > { %p646_p7 = scmp.lt.s32.totalorder %s644_s17, %s639_s13 }
  0x2f   : > { %p642_p0 = pnand %p640_p9, %p611_p3 }
  0x30   : > { %p647_p5 = por %p646_p7, %p645_p4 }
  0x31   : > { %p643_p1 = pneg %p642_p0 }
  0x33   : > { %p648_p8 = pnand %p647_p5, %p643_p1 }
  0x35   : > { %651 = shalt.err (!%p648_p8)
}
  0x36   : > { %568 = dma.hbm_to_vmem [thread:$0]  (!%p837_p13), %s222_s10, 64, %s224_s26, %s212_s11  }
  0x37   : > { %232 = sbr.rel (%p862_p2) target bundleno = 247 (0xf7), region = 40  ;;  %s885_s7 = sand.u32 (!%p862_p2), 1, %s729_s19  }
  0x38   : > { %s529_s14 = sshll.u32 (!%p862_p2), %s885_s7, 1  ;;  %s235_s28 = scalar_lea.sflag (!%p862_p2), [#allocation3], %s885_s7 }
  0x39   : > { %s889_s27 = scalar_lea.vmem (!%p862_p2), [#allocation2], %s529_s14 }
  0x3c   : > { %712 = dma.done.wait (%p812_p6), %s235_s28, 32  }
  0x3d   : > { %714 = vsyncadd (%p812_p6), %s235_s28, 4294967264  ;;  %s530_s3 = sshll.u32 %s885_s7, 2  ;;  %s245_s16 = scalar_lea.sflag [#allocation6], %s885_s7 }
  0x3e   : > { %s899_s12 = scalar_lea.vmem [#allocation5], %s530_s3 }
  0x3f   : > { %716 = dma.done.wait (%p812_p6), %s245_s16, 64  }
  0x40   : > { %718 = vsyncadd (%p812_p6), %s245_s16, 4294967232  ;;  %v282_v0 = vld [vmem:[%s889_s27] sm:$0x1]  ;;  %v287_v3 = vld [vmem:[%s965_s1 + $0x8] sm:$0xff]  ;;  %vm330_vm0 = vcmask 130048   ;;  %vm405_vm1 = vcmask 1041409  }
  0x41   : > { %v283_v1 = vmul.f32 15.0, %v282_v0  ;;  %v286_v2 = vld [vmem:[%s965_s1] sm:$0xff]  ;;  %v552_v15 = vld [vmem:[%s964_s0 + $0x8] sm:$0xff]  ;;  %v553_v16 = vld [vmem:[%s964_s0 + $0x10] sm:$0xff]  ;;  %vm408_vm2 = vcmask 1042434   ;;  %s687_s23 = scalar_lea.hbm %s969_s5, 8 }
  0x42   : > { %v551_v14 = vld [vmem:[%s964_s0] sm:$0xff]  ;;  %v298_v21 = vld [vmem:[%s966_s2 + $0x8] sm:$0xff] }
  0x43   : > { %v288_v4 = vperm.slane %v283_v1, 0  ;;  %v284_v17 = vld [vmem:[%s889_s27 + $0x1] sm:$0x1]  ;;  %v391_v52 = vld [vmem:[%s899_s12] sm:$0x7]  ;;  %s548_s27 = sshll.u32 %s790_s22, 2 }
  0x44   : > { %v285_v18 = vmul.f32 15.0, %v284_v17  ;;  %v297_v20 = vld [vmem:[%s966_s2] sm:$0xff]  ;;  %v393_v58 = vrot.slane %v391_v52, 1  ;;  %v394_v0 = vrot.slane %v391_v52, 2  ;;  %s423_s9 = scalar_lea.hbm %s969_s5, %s548_s27  ;;  %s280_s12 = scalar_lea.vmem [#allocation7], %s530_s3 }
  0x45   : > { %v289_v5 = vsub.f32 %v286_v2, %v288_v4  ;;  %v290_v6 = vsub.f32 %v287_v3, %v288_v4  ;;  %s425_s10 = sshll.u32 %s280_s12, 4  ;;  %s427_s29 = sshll.u32 %s423_s9, 4  ;;  %s426_s10 = int_to_ptr.vmem [resolvable:$true] %s425_s10  ;;  %s428_s29 = int_to_ptr.hbm [resolvable:$true] %s427_s29 }
  0x46   : > { %v299_v19 = vperm.slane %v285_v18, 0  ;;  %s413_s22 = scalar_lea.sflag [#allocation4], %s885_s7  ;;  %s681_s11 = sshra.s32 %s428_s29, 4  ;;  %s682_s11 = int_to_ptr.hbm [resolvable:$true] %s681_s11 }
  0x47   : > { %v291_v7 = vand.u32 2147483647, %v289_v5  ;;  %v292_v8 = vand.u32 2147483647, %v290_v6  ;;  %s683_s13 = scalar_lea.hbm %s682_s11, 4  ;;  %p688_p10 = scmp.lt.s32.totalorder %s682_s11, %s969_s5 }
  0x48   : > { %v300_v22 = vsub.f32 %v297_v20, %v299_v19  ;;  %v301_v23 = vsub.f32 %v298_v21, %v299_v19  ;;  %p684_p6 = scmp.ne.s32.totalorder %s682_s11, %s683_s13  ;;  %p689_p2 = scmp.lt.s32.totalorder %s687_s23, %s683_s13 }
  0x49   : > { %v293_v9 = vsub.f32 1.0, %v291_v7  ;;  %v294_v10 = vsub.f32 1.0, %v292_v8 }
  0x4a   : > { %v302_v24 = vand.u32 2147483647, %v300_v22  ;;  %v303_v25 = vand.u32 2147483647, %v301_v23  ;;  %p685_p13 = pnand %p684_p6, %p819_p11  ;;  %p690_p9 = por %p689_p2, %p688_p10 }
  0x4b   : > { %v295_v11 = vmax.f32 %v293_v9, 0.0  ;;  %v296_v12 = vmax.f32 %v294_v10, 0.0 }
  0x4c   : > { %v304_v28 = vsub.f32 1.0, %v302_v24  ;;  %v305_v29 = vsub.f32 1.0, %v303_v25  ;;  %p686_p3 = pneg %p685_p13 }
  0x4d   : > { %v314_v13 = vpack.c.bf16 %v296_v12, %v295_v11 }
  0x4e   : > { %v306_v30 = vmax.f32 %v304_v28, 0.0  ;;  %v307_v31 = vmax.f32 %v305_v29, 0.0  ;;  %p691_p0 = pnand %p690_p9, %p686_p3 }
  0x4f   : > { %347 = vmatpush.bf16.msra.mxu0 %v314_v13  ;;  %554 = vmatpush.bf16.msra.mxu1 %v314_v13 }
  0x50   : > { %555 = vmatpush.bf16.msra.mxu2 %v314_v13 }
  0x52   : > { %544 = vmatmul.msk.bf16.vlgmr.msra.gmra.mxu0 %vm330_vm0, %v551_v14  ;;  %545 = vmatmul.msk.bf16.vlgmr.msra.gmra.mxu1 %vm330_vm0, %v552_v15 }
  0x53   : > { %546 = vmatmul.msk.bf16.vlgmr.msra.gmra.mxu2 %vm330_vm0, %v553_v16 }
  0xcf   : > { %v349_v26 = vpop.f32.mrf.mxu0  ;;  %v354_v27 = vpop.f32.mrf.mxu1 }
  0xd0   : > { %v364_v32 = vmul.f32 %v349_v26, %v306_v30  ;;  %v366_v36 = vmul.f32 %v354_v27, %v306_v30 }
  0xd6   : > { %v359_v33 = vpop.f32.mrf.mxu2 }
  0xd7   : > { %v351_v34 = vpop.f32.mrf.mxu0  ;;  %v356_v35 = vpop.f32.mrf.mxu1  ;;  %v368_v46 = vmul.f32 %v359_v33, %v306_v30 }
  0xd8   : > { %v365_v37 = vmul.f32 %v351_v34, %v307_v31  ;;  %v367_v38 = vmul.f32 %v356_v35, %v307_v31 }
  0xda   : > { %v370_v39 = vadd.f32 %v365_v37, %v364_v32  ;;  %v377_v40 = vadd.f32 %v367_v38, %v366_v36 }
  0xdc   : > { %v371_v41 = vrot.slane %v370_v39, 4  ;;  %v378_v42 = vrot.slane %v377_v40, 4 }
  0xde   : > { %v372_v43 = vadd.f32 %v371_v41, %v370_v39  ;;  %v379_v44 = vadd.f32 %v378_v42, %v377_v40  ;;  %v361_v45 = vpop.f32.mrf.mxu2 }
  0xdf   : > { %v369_v47 = vmul.f32 %v361_v45, %v307_v31 }
  0xe0   : > { %v373_v48 = vrot.slane %v372_v43, 2  ;;  %v380_v49 = vrot.slane %v379_v44, 2 }
  0xe1   : > { %v384_v50 = vadd.f32 %v369_v47, %v368_v46 }
  0xe2   : > { %v381_v51 = vadd.f32 %v380_v49, %v379_v44  ;;  %v374_v54 = vadd.f32 %v373_v48, %v372_v43 }
  0xe3   : > { %v385_v53 = vrot.slane %v384_v50, 4 }
  0xe4   : > { %v382_v55 = vrot.slane %v381_v51, 1  ;;  %v375_v60 = vrot.slane %v374_v54, 1 }
  0xe5   : > { %v386_v56 = vadd.f32 %v385_v53, %v384_v50 }
  0xe6   : > { %v383_v57 = vadd.f32 %v382_v55, %v381_v51  ;;  %v376_v1 = vadd.f32 %v375_v60, %v374_v54 }
  0xe7   : > { %v387_v59 = vrot.slane %v386_v56, 2 }
  0xe8   : > { %v399_v62 = vadd.f32 %v393_v58, %v383_v57  ;;  %v398_v5 = vadd.f32 %v391_v52, %v376_v1 }
  0xe9   : > { %v388_v61 = vadd.f32 %v387_v59, %v386_v56 }
  0xea   : > { %v404_v3 = vrot.slane %v399_v62, 7 }
  0xeb   : > { %v389_v63 = vrot.slane %v388_v61, 1 }
  0xec   : > { %v406_v7 = vsel %vm405_vm1, %v404_v3, %v398_v5 }
  0xed   : > { %v390_v2 = vadd.f32 %v389_v63, %v388_v61 }
  0xef   : > { %v400_v4 = vadd.f32 %v394_v0, %v390_v2 }
  0xf1   : > { %v407_v6 = vrot.slane %v400_v4, 6 }
  0xf3   : > { %v409_v8 = vsel %vm408_vm2, %v407_v6, %v406_v7 }
  0xf4   : > { %411 = vst [vmem:[%s280_s12] sm:$0x7] %v409_v8 }
  0xf5   : > { %694 = shalt.err (!%p691_p0)
}
  0xf6   : > { %560 = dma.vmem_to_hbm [thread:$0]  (%p819_p11), %s426_s10, 64, %s428_s29, %s413_s22  }
  0xf7 PF: > { %s439_s7 = sand.u32 1, %s725_s18   ;;  %p979_p1 = scmp.ge.s32.totalorder %s737_s21, 2 }
  0xf8   : > { %s440_s14 = scalar_lea.sflag [#allocation4], %s439_s7 }
  0xf9   : > { %p570_p4 = pnand %p979_p1, %p823_p12 }
  0xfb   : > { %p571_p7 = pneg %p570_p4 }
  0xfd   : > { %720 = dma.done.wait (%p571_p7), %s440_s14, 64  }
  0xfe   : > { %722 = vsyncadd (%p571_p7), %s440_s14, 4294967232  ;;  %s980_s28 = sld [smem:[#allocation11_spill]]  ;;  %p21_p5 = scmp.ge.s32.totalorder %s794_s24, 4  }
  0xff   : > { %s981_s18 = smov %s729_s19  ;;  %s982_s19 = smov %s733_s20 }
 0x100   : > { %s984_s21 = smov %s794_s24  ;;  %23 = sbr.rel (!%p21_p5) target bundleno = 9 (0x9), region = 98 }
 0x104   : > { %s983_s20 = smov %s980_s28 }
 0x105   :  { %446 = vsyncpa [#allocation3], 1 }
 0x106   :  { %448 = vsyncpa [#allocation3 + $0x1], 1 }
 0x107   :  { %449 = vsyncpa [#allocation6], 1 }
 0x108   :  { %451 = vsyncpa [#allocation6 + $0x1], 1 }
 0x109   :  { %452 = vsyncpa [#allocation4], 1 }
 0x10a   :  { %454 = vsyncpa [#allocation4 + $0x1], 1 }

</bundles_post_ra>
